<compile_context>
chip_gen: v7x
topology: tpu7x:2x2x1
jax: 0.10.0
libtpu: 0.0.40
codegen_flags: <defaults>
</compile_context>

<pallas_src>
import jax
import jax.numpy as jnp
from jax.experimental import pallas as pl
from jax.experimental.pallas import tpu as pltpu

EPSILON = 1e-05


def _make_ce_kernel(n_valid, tile_n, mask_rows):
    def _ce_kernel(inp_ref, tgt_ref, out_ref):
        x = inp_ref[...].astype(jnp.float32)       # (tile_n, C)
        t = tgt_ref[...].astype(jnp.float32)       # (tile_n, C)

        # softmax along the class (lane) axis
        shift = x - jnp.max(x, axis=1, keepdims=True)
        num = jnp.exp(shift)
        # per-row exact reciprocal + VPU multiply instead of per-element divide
        inv = pl.reciprocal(jnp.sum(num, axis=1, keepdims=True), approx=False)
        pred = num * inv

        elem = -jnp.log(pred * t + EPSILON)        # (tile_n, C)

        if mask_rows:
            # zero out contributions from padded batch rows
            row = (jax.lax.broadcasted_iota(jnp.int32, elem.shape, 0)
                   + pl.program_id(0) * tile_n)
            elem = jnp.where(row < n_valid, elem, 0.0)

        partial = jnp.sum(elem)                    # scalar partial for this block
        # lane-dense per-block output; wrapper picks element [0, 0] of each block
        out_ref[...] = jnp.full(out_ref.shape, partial, dtype=jnp.float32)

    return _ce_kernel


def _choose_tile_n(n_pad, c):
    """Largest batch tile (multiple of 8, divides n_pad) within a VMEM budget."""
    # 2 f32 inputs x 2 pipeline buffers x tile_n x c x 4B  <=  ~24 MiB
    budget_rows = (24 * 1024 * 1024) // (16 * c)
    tile = min(n_pad, 1024, max(8, (budget_rows // 8) * 8))
    while n_pad % tile != 0:
        tile -= 8
    return max(tile, 8)


@jax.jit
def cross_entropy_loss(inp, target):
    """Pallas equivalent of CrossEntropyLoss.forward(inp, target).

    inp:    (N, C) float logits
    target: tensor with N*C elements (reshaped to (N, C), cast to float)
    returns scalar float32 loss = sum(-log(softmax(inp, 1) * target + 1e-5))
    """
    n, c = inp.shape
    target = target.reshape(n, c)

    # pad batch up to a multiple of 8 (sublane granularity); padded rows masked
    n_pad = ((n + 7) // 8) * 8
    if n_pad != n:
        pad = n_pad - n
        inp = jnp.pad(inp, ((0, pad), (0, 0)))
        target = jnp.pad(target, ((0, pad), (0, 0)))

    tile_n = _choose_tile_n(n_pad, c)
    num_blocks = n_pad // tile_n

    kernel = _make_ce_kernel(n, tile_n, mask_rows=(n_pad != n))

    in_bytes = (n_pad * c * inp.dtype.itemsize
                + n_pad * c * target.dtype.itemsize)
    cost = pl.CostEstimate(
        flops=6 * n_pad * c,
        transcendentals=2 * n_pad * c + n_pad,  # exp + log per elem, recip per row
        bytes_accessed=in_bytes + num_blocks * 8 * 128 * 4,
    )

    # double-buffered f32 inputs + tiny output blocks, with headroom
    vmem_needed = 2 * 2 * tile_n * c * 4 + 2 * 8 * 128 * 4
    vmem_limit = int(min(max(vmem_needed + (4 << 20), 16 << 20), 48 << 20))

    out = pl.pallas_call(
        kernel,
        out_shape=jax.ShapeDtypeStruct((num_blocks * 8, 128), jnp.float32),
        grid=(num_blocks,),
        in_specs=[
            pl.BlockSpec((tile_n, c), lambda i: (i, 0)),
            pl.BlockSpec((tile_n, c), lambda i: (i, 0)),
        ],
        out_specs=pl.BlockSpec((8, 128), lambda i: (i, 0)),
        compiler_params=pltpu.CompilerParams(
            dimension_semantics=("parallel",),
            vmem_limit_bytes=vmem_limit,
        ),
        cost_estimate=cost,
    )(inp, target)

    partials = out.reshape(num_blocks, 8, 128)[:, 0, 0]
    return jnp.sum(partials)


def _reference(inp, target):
    # Pure-JAX reference mirroring the PyTorch code exactly.
    shift = inp - jnp.max(inp, axis=1, keepdims=True)
    num = jnp.exp(shift)
    pred = num / jnp.sum(num, axis=1, keepdims=True)
    t = target.astype(jnp.float32).reshape(pred.shape)
    return jnp.sum(-jnp.log(pred * t + EPSILON))


if __name__ == "__main__":
    key = jax.random.PRNGKey(0)
    k1, k2 = jax.random.split(key)

    N, C = 8, 32  # small (batch, classes)
    inp = jax.random.normal(k1, (N, C), dtype=jnp.float32)

    # one-hot float targets, shaped like pred (the module reshapes/casts anyway)
    labels = jax.random.randint(k2, (N,), 0, C)
    target = jax.nn.one_hot(labels, C, dtype=jnp.float32)

    loss = cross_entropy_loss(inp, target)
    jax.block_until_ready(loss)

    ref = _reference(inp, target)
    assert jnp.allclose(loss, ref, rtol=1e-5, atol=1e-5), (loss, ref)

    print("KERNEL_OK")
</pallas_src>

<mosaic_0001>
module attributes {stable_mosaic.version = 11 : i64} {
  func.func @_ce_kernel(%arg0: i32, %arg1: memref<8x32xf32, #tpu.memory_space<vmem>>, %arg2: memref<8x32xf32, #tpu.memory_space<vmem>>, %arg3: memref<8x128xf32, #tpu.memory_space<vmem>>) attributes {dimension_semantics = [#tpu.dimension_semantics<parallel>], iteration_bounds = array<i64: 1>, scalar_prefetch = 0 : i64, scratch_operands = 0 : i64, tpu.core_type = #tpu.core_type<tc>, window_params = [{transform_indices = @transform_0, window_bounds = array<i64: 8, 32>}, {transform_indices = @transform_1, window_bounds = array<i64: 8, 32>}, {transform_indices = @transform_2, window_bounds = array<i64: 8, 128>}]} {
    %c0 = arith.constant 0 : index
    %c0_0 = arith.constant 0 : index
    %0 = vector.load %arg1[%c0, %c0_0] : memref<8x32xf32, #tpu.memory_space<vmem>>, vector<8x32xf32>
    %c0_1 = arith.constant 0 : index
    %c0_2 = arith.constant 0 : index
    %1 = vector.load %arg2[%c0_1, %c0_2] : memref<8x32xf32, #tpu.memory_space<vmem>>, vector<8x32xf32>
    %cst = arith.constant dense<0xFF800000> : vector<8xf32>
    %2 = vector.multi_reduction <maximumf>, %0, %cst [1] : vector<8x32xf32> to vector<8xf32>
    %3 = vector.shape_cast %2 : vector<8xf32> to vector<8x1xf32>
    %4 = vector.broadcast %3 : vector<8x1xf32> to vector<8x32xf32>
    %5 = arith.subf %0, %4 : vector<8x32xf32>
    %6 = math.exp %5 : vector<8x32xf32>
    %cst_3 = arith.constant dense<0.000000e+00> : vector<8xf32>
    %7 = vector.multi_reduction <add>, %6, %cst_3 [1] : vector<8x32xf32> to vector<8xf32>
    %8 = vector.shape_cast %7 : vector<8xf32> to vector<8x1xf32>
    %9 = tpu.reciprocal %8 : vector<8x1xf32> -> vector<8x1xf32>
    %10 = vector.broadcast %9 : vector<8x1xf32> to vector<8x32xf32>
    %11 = arith.mulf %6, %10 : vector<8x32xf32>
    %12 = arith.mulf %11, %1 : vector<8x32xf32>
    %cst_4 = arith.constant 9.99999974E-6 : f32
    %13 = vector.broadcast %cst_4 : f32 to vector<8x32xf32>
    %14 = arith.addf %12, %13 : vector<8x32xf32>
    %15 = math.log %14 : vector<8x32xf32>
    %cst_5 = arith.constant 0.000000e+00 : f32
    %16 = vector.broadcast %cst_5 : f32 to vector<8x32xf32>
    %17 = arith.subf %16, %15 : vector<8x32xf32>
    %18 = vector.shape_cast %17 : vector<8x32xf32> to vector<1x8x32xf32>
    %cst_6 = arith.constant dense<0.000000e+00> : vector<1xf32>
    %19 = vector.multi_reduction <add>, %18, %cst_6 [1, 2] : vector<1x8x32xf32> to vector<1xf32>
    %20 = vector.shape_cast %19 : vector<1xf32> to vector<1x1x1xf32>
    %21 = vector.extract %20[0, 0, 0] : f32 from vector<1x1x1xf32>
    %22 = vector.broadcast %21 : f32 to vector<8x128xf32>
    %c0_7 = arith.constant 0 : index
    %c0_8 = arith.constant 0 : index
    %23 = vector.load %arg3[%c0_7, %c0_8] : memref<8x128xf32, #tpu.memory_space<vmem>>, vector<8x128xf32>
    tpu.vector_store %arg3[%c0_7, %c0_8], %22 {strides = array<i32>} : memref<8x128xf32, #tpu.memory_space<vmem>>, vector<8x128xf32>,
    return
  }
  func.func @transform_0(%arg0: i32) -> (i32, i32) {
    %c0_i32 = arith.constant 0 : i32
    %c0_i32_0 = arith.constant 0 : i32
    return %arg0, %c0_i32 : i32, i32
  }
  func.func @transform_1(%arg0: i32) -> (i32, i32) {
    %c0_i32 = arith.constant 0 : i32
    %c0_i32_0 = arith.constant 0 : i32
    return %arg0, %c0_i32 : i32, i32
  }
  func.func @transform_2(%arg0: i32) -> (i32, i32) {
    %c0_i32 = arith.constant 0 : i32
    %c0_i32_0 = arith.constant 0 : i32
    return %arg0, %c0_i32 : i32, i32
  }
}

</mosaic_0001>

<bundles_post_ra>
// kernel: cross_entropy_loss.1
= control target key start
LH: loop header
LB: loop body
LE: loop exit
PB: predicated region body
PF: predicated region fallthrough
CT: control target
= control target key end

     0   :  { %7 = vsyncpa [#allocation3], 0  ;;  %s177_s0 = inlined_call_operand.hbm [shape: f32[8,32], index: 0, kind: input, shape index: {}]   ;;  %s178_s1 = inlined_call_operand.hbm [shape: f32[8,32], index: 1, kind: input, shape index: {}]   ;;  %s179_s2 = inlined_call_operand.vmem [shape: f32[8,128], index: 2, kind: output, shape index: {}]  }
   0x1   :  { %8 = vsyncpa [#allocation5], 0  ;;  %s130_s9 = smov [#allocation2]   ;;  %s131_s11 = smov [#allocation4]  }
   0x2   :  { %s15_s10 = sshll.u32 %s130_s9, 4  ;;  %s25_s12 = sshll.u32 %s131_s11, 4  ;;  %s16_s10 = int_to_ptr.vmem [resolvable:$true] %s15_s10  ;;  %s26_s12 = int_to_ptr.vmem [resolvable:$true] %s25_s12 }
   0x3   :  { %s82_s15 = scalar_lea.hbm %s177_s0, 128 }
   0x4   :  { %p83_p0 = scmp.ne.s32.totalorder %s177_s0, %s82_s15  ;;  %p86_p1 = scmp.lt.u32.totalorder %s82_s15, %s177_s0 }
   0x6   :  { %p88_p2 = pnand %p86_p1, %p83_p0 }
   0x8   :  { %91 = shalt.err (!%p88_p2)
}
   0x9   :  { %s92_s20 = scalar_lea.vmem %s16_s10, 128  ;;  %p97_p4 = scmp.lt.s32.totalorder %s16_s10, %s16_s10 }
   0xa   :  { %p93_p3 = scmp.ne.s32.totalorder %s16_s10, %s92_s20  ;;  %p98_p5 = scmp.lt.s32.totalorder %s92_s20, %s92_s20 }
   0xc   :  { %p99_p6 = por %p98_p5, %p97_p4 }
   0xe   :  { %p100_p7 = pnand %p99_p6, %p93_p3 }
  0x10   :  { %103 = shalt.err (!%p100_p7)
}
  0x11   :  { %18 = dma.hbm_to_vmem [thread:$0]  %s177_s0, 128, %s16_s10, [#allocation3]  }
  0x12   :  { %s104_s25 = scalar_lea.hbm %s178_s1, 128 }
  0x13   :  { %p105_p8 = scmp.ne.s32.totalorder %s178_s1, %s104_s25  ;;  %p108_p9 = scmp.lt.u32.totalorder %s104_s25, %s178_s1 }
  0x15   :  { %p110_p10 = pnand %p108_p9, %p105_p8 }
  0x17   :  { %113 = shalt.err (!%p110_p10)
}
  0x18   :  { %s114_s30 = scalar_lea.vmem %s26_s12, 128  ;;  %p119_p12 = scmp.lt.s32.totalorder %s26_s12, %s26_s12 }
  0x19   :  { %p115_p11 = scmp.ne.s32.totalorder %s26_s12, %s114_s30  ;;  %p120_p13 = scmp.lt.s32.totalorder %s114_s30, %s114_s30 }
  0x1b   :  { %p121_p0 = por %p120_p13, %p119_p12 }
  0x1d   :  { %p122_p1 = pnand %p121_p0, %p115_p11 }
  0x1f   :  { %125 = shalt.err (!%p122_p1)
}
  0x20   :  { %28 = dma.hbm_to_vmem [thread:$0]  %s178_s1, 128, %s26_s12, [#allocation5]  }
  0x21   :  { %126 = dma.done.wait [#allocation3], 128  }
  0x22   :  { %127 = vsyncadd [#allocation3], 4294967168 }
  0x23   :  { %128 = dma.done.wait [#allocation5], 128  }
  0x24   :  { %129 = vsyncadd [#allocation5], 4294967168  ;;  %vm37_vm0 = vcmask 261120   ;;  %v35_v0 = vld [vmem:[#allocation2] sm:$0xff]  ;;  %v36_v9 = vld [vmem:[#allocation4] sm:$0xff] }
  0x25   :  { %v38_v1 = vsel %vm37_vm0, %v35_v0, -inf }
  0x26   :  { %39 = vmax.xlane.f32.xlu0 %v38_v1 }
  0xb3   :  { %v40_v2 = vpop.xlane.xlu0 %39 }
  0xb4   :  { %v41_v3 = vsub.f32 %v35_v0, %v40_v2 }
  0xb6   :  { %v42_v4 = vmul.f32 1.442695, %v41_v3 }
  0xb8   :  { %76 = vpow2.f32 %v42_v4 }
  0xc2   :  { %v77_v5 = vpop.eup %76 }
  0xc3   :  { %v44_v6 = vsel %vm37_vm0, %v77_v5, 0.0 }
  0xc4   :  { %45 = vadd.xlane.f32.xlu0 %v44_v6 }
 0x151   :  { %v46_v7 = vpop.xlane.xlu0 %45 }
 0x152   :  { %78 = vrcp.f32 %v46_v7 }
 0x15c   :  { %v79_v8 = vpop.eup %78 }
 0x15d   :  { %v48_v10 = vmul.f32 %v79_v8, %v77_v5 }
 0x15f   :  { %v49_v11 = vmul.f32 %v48_v10, %v36_v9 }
 0x161   :  { %v50_v12 = vadd.f32 1e-05, %v49_v11 }
 0x163   :  { %80 = vlog2.f32 %v50_v12 }
 0x16d   :  { %v81_v13 = vpop.eup %80 }
 0x16e   :  { %v52_v14 = vmul.f32 0.6931472, %v81_v13 }
 0x170   :  { %v53_v15 = vsub.f32 0.0, %v52_v14 }
 0x172   :  { %v54_v16 = vsel %vm37_vm0, %v53_v15, 0.0 }
 0x173   :  { %55 = vadd.xlane.f32.xlu1 %v54_v16 }
 0x200   :  { %v56_v17 = vpop.xlane.xlu1 %55 }
 0x201   :  { %v57_v18 = vrot.slane %v56_v17, 4 }
 0x203   :  { %v58_v19 = vadd.f32 %v57_v18, %v56_v17 }
 0x205   :  { %v59_v20 = vrot.slane %v58_v19, 2 }
 0x207   :  { %v60_v21 = vadd.f32 %v59_v20, %v58_v19 }
 0x209   :  { %v61_v22 = vrot.slane %v60_v21, 1 }
 0x20b   :  { %v62_v23 = vadd.f32 %v61_v22, %v60_v21 }
 0x20d   :  { %72 = vpush %v62_v23 }
 0x23e   :  { %s73_s1 = spop %72 }
 0x23f   :  { %v64_v24 = vstv %s73_s1 }
 0x240   :  { %65 = vst [vmem:[%s179_s2] sm:$0xff] %v64_v24 }
 0x241   :  { %70 = vsyncpa [#allocation3], 1 }
 0x242   :  { %71 = vsyncpa [#allocation5], 1 }

</bundles_post_ra>
